<compile_context>
chip_gen: v5e
topology: v5e:2x2
jax: 0.10.0
libtpu: 0.0.40
codegen_flags: <defaults>
</compile_context>

<pallas_src>
import functools

import jax
import jax.numpy as jnp
from jax.experimental import pallas as pl
from jax.experimental.pallas import tpu as pltpu

_H1, _H2, _H3 = 128, 64, 32
_OUT_PAD = 128  # lane-dense output slab width


def _round_up(x, m):
    return ((x + m - 1) // m) * m


def _dqn_kernel(x_ref, w1_ref, b1_ref, w2_ref, b2_ref, w3_ref, b3_ref,
                w4_ref, b4_ref, o_ref, *, activation, matmul_dtype):
    """One batch tile of the fused 4-layer MLP.

    Weights arrive already cast to `matmul_dtype` (bf16 by default); every
    jnp.dot accumulates in f32 on the MXU, and bias-add / activation run in
    f32 on the VPU/EUP before the activations are narrowed again for the
    next layer's matmul.
    """
    if activation == 'tanh':
        act = jnp.tanh
    else:
        act = lambda v: jnp.maximum(v, 0.0)

    x = x_ref[...].astype(matmul_dtype)
    h = act(jnp.dot(x, w1_ref[...], preferred_element_type=jnp.float32)
            + b1_ref[...])
    h = act(jnp.dot(h.astype(matmul_dtype), w2_ref[...],
                    preferred_element_type=jnp.float32) + b2_ref[...])
    h = act(jnp.dot(h.astype(matmul_dtype), w3_ref[...],
                    preferred_element_type=jnp.float32) + b3_ref[...])
    out = (jnp.dot(h.astype(matmul_dtype), w4_ref[...],
                   preferred_element_type=jnp.float32) + b4_ref[...])
    o_ref[...] = out.astype(o_ref.dtype)


def dqn_forward(x, params, activation='relu', matmul_dtype=jnp.bfloat16,
                tile_b=256):
    """params = dict with w1..w4 of shape (in, out) and b1..b4 of shape (1, out).

    Returns (B, action_size) float32 Q-values, matching the PyTorch module.
    """
    B, state_size = x.shape
    action_size = params['w4'].shape[1]

    # Batch tiling: tile must be a multiple of 8 (sublane); pad B up to a
    # whole number of tiles so every block is full (padded rows are zeros and
    # are sliced away at the end).
    tile_b = max(8, min(tile_b, _round_up(B, 8)))
    b_pad = _round_up(B, tile_b)
    x_p = x if b_pad == B else jnp.pad(x, ((0, b_pad - B), (0, 0)))

    # Zero-pad the last layer to a lane-dense 128-wide output slab.
    w4_p = jnp.pad(params['w4'], ((0, 0), (0, _OUT_PAD - action_size)))
    b4_p = jnp.pad(params['b4'], ((0, 0), (0, _OUT_PAD - action_size)))

    # Weights in the matmul dtype (bf16 by default); biases stay f32 so the
    # bias-add / activation happen on the f32 accumulator.
    w1 = params['w1'].astype(matmul_dtype)
    w2 = params['w2'].astype(matmul_dtype)
    w3 = params['w3'].astype(matmul_dtype)
    w4 = w4_p.astype(matmul_dtype)
    b1 = params['b1'].astype(jnp.float32)
    b2 = params['b2'].astype(jnp.float32)
    b3 = params['b3'].astype(jnp.float32)
    b4 = b4_p.astype(jnp.float32)

    operands = (x_p, w1, b1, w2, b2, w3, b3, w4, b4)

    def resident_spec(arr):
        # Whole array as one block, same block for every grid step ->
        # stays VMEM-resident across the batch grid.
        return pl.BlockSpec(arr.shape, lambda i: (0, 0))

    in_specs = [pl.BlockSpec((tile_b, state_size), lambda i: (i, 0))]
    in_specs += [resident_spec(a) for a in operands[1:]]
    out_spec = pl.BlockSpec((tile_b, _OUT_PAD), lambda i: (i, 0))

    flops = 2 * b_pad * (state_size * _H1 + _H1 * _H2 + _H2 * _H3
                         + _H3 * _OUT_PAD)
    transcendentals = b_pad * (_H1 + _H2 + _H3) if activation == 'tanh' else 0
    bytes_accessed = (sum(int(a.size) * a.dtype.itemsize for a in operands)
                      + b_pad * _OUT_PAD * 4)

    kernel = functools.partial(_dqn_kernel, activation=activation,
                               matmul_dtype=matmul_dtype)

    out = pl.pallas_call(
        kernel,
        out_shape=jax.ShapeDtypeStruct((b_pad, _OUT_PAD), jnp.float32),
        grid=(b_pad // tile_b,),
        in_specs=in_specs,
        out_specs=out_spec,
        compiler_params=pltpu.CompilerParams(
            dimension_semantics=("parallel",)),
        cost_estimate=pl.CostEstimate(
            flops=flops, transcendentals=transcendentals,
            bytes_accessed=bytes_accessed),
    )(*operands)

    return out[:B, :action_size]


def init_dqn_params(key, state_size, action_size):
    """Deterministic init mimicking nn.Linear shapes (weights stored (in, out))."""
    sizes = [(state_size, _H1), (_H1, _H2), (_H2, _H3), (_H3, action_size)]
    params = {}
    for i, (fan_in, fan_out) in enumerate(sizes, start=1):
        key, kw, kb = jax.random.split(key, 3)
        bound = 1.0 / jnp.sqrt(fan_in)
        params[f'w{i}'] = jax.random.uniform(
            kw, (fan_in, fan_out), jnp.float32, -bound, bound)
        params[f'b{i}'] = jax.random.uniform(
            kb, (1, fan_out), jnp.float32, -bound, bound)
    return params


def dqn_reference(x, params, activation='relu'):
    """Pure-JAX f32 reference for correctness checking."""
    act = jnp.tanh if activation == 'tanh' else lambda v: jnp.maximum(v, 0.0)
    h = act(x @ params['w1'] + params['b1'])
    h = act(h @ params['w2'] + params['b2'])
    h = act(h @ params['w3'] + params['b3'])
    return h @ params['w4'] + params['b4']


if __name__ == "__main__":
    key = jax.random.PRNGKey(0)
    state_size, action_size, batch = 16, 4, 8

    kp, kx = jax.random.split(key)
    params = init_dqn_params(kp, state_size, action_size)
    x = jax.random.normal(kx, (batch, state_size), jnp.float32)

    ok = True
    for act_fn in ('relu', 'tanh'):
        ref = dqn_reference(x, params, activation=act_fn)

        # Strict check with the f32 matmul path.
        out_f32 = jax.block_until_ready(
            dqn_forward(x, params, activation=act_fn,
                        matmul_dtype=jnp.float32))
        if not jnp.allclose(out_f32, ref, atol=1e-5, rtol=1e-5):
            ok = False
            print(f"MISMATCH (f32) activation={act_fn}: "
                  f"max abs err {jnp.max(jnp.abs(out_f32 - ref))}")

        # Looser check for the bf16-in / f32-accumulate fast path.
        out_bf16 = jax.block_until_ready(
            dqn_forward(x, params, activation=act_fn,
                        matmul_dtype=jnp.bfloat16))
        if not jnp.allclose(out_bf16, ref, atol=5e-2, rtol=5e-2):
            ok = False
            print(f"MISMATCH (bf16) activation={act_fn}: "
                  f"max abs err {jnp.max(jnp.abs(out_bf16 - ref))}")

    if ok:
        print("KERNEL_OK")
</pallas_src>

<mosaic_0001>
module attributes {stable_mosaic.version = 11 : i64} {
  func.func @_dqn_kernel(%arg0: i32, %arg1: memref<8x16xf32, #tpu.memory_space<vmem>>, %arg2: memref<16x128xf32, #tpu.memory_space<vmem>>, %arg3: memref<1x128xf32, #tpu.memory_space<vmem>>, %arg4: memref<128x64xf32, #tpu.memory_space<vmem>>, %arg5: memref<1x64xf32, #tpu.memory_space<vmem>>, %arg6: memref<64x32xf32, #tpu.memory_space<vmem>>, %arg7: memref<1x32xf32, #tpu.memory_space<vmem>>, %arg8: memref<32x128xf32, #tpu.memory_space<vmem>>, %arg9: memref<1x128xf32, #tpu.memory_space<vmem>>, %arg10: memref<8x128xf32, #tpu.memory_space<vmem>>) attributes {dimension_semantics = [#tpu.dimension_semantics<parallel>], iteration_bounds = array<i64: 1>, scalar_prefetch = 0 : i64, scratch_operands = 0 : i64, tpu.core_type = #tpu.core_type<tc>, window_params = [{transform_indices = @transform_0, window_bounds = array<i64: 8, 16>}, {pipeline_mode = #tpu.pipeline_mode<synchronous>, transform_indices = @transform_1, window_bounds = array<i64: 16, 128>}, {pipeline_mode = #tpu.pipeline_mode<synchronous>, transform_indices = @transform_2, window_bounds = array<i64: 1, 128>}, {pipeline_mode = #tpu.pipeline_mode<synchronous>, transform_indices = @transform_3, window_bounds = array<i64: 128, 64>}, {pipeline_mode = #tpu.pipeline_mode<synchronous>, transform_indices = @transform_4, window_bounds = array<i64: 1, 64>}, {pipeline_mode = #tpu.pipeline_mode<synchronous>, transform_indices = @transform_5, window_bounds = array<i64: 64, 32>}, {pipeline_mode = #tpu.pipeline_mode<synchronous>, transform_indices = @transform_6, window_bounds = array<i64: 1, 32>}, {pipeline_mode = #tpu.pipeline_mode<synchronous>, transform_indices = @transform_7, window_bounds = array<i64: 32, 128>}, {pipeline_mode = #tpu.pipeline_mode<synchronous>, transform_indices = @transform_8, window_bounds = array<i64: 1, 128>}, {transform_indices = @transform_9, window_bounds = array<i64: 8, 128>}]} {
    %c0 = arith.constant 0 : index
    %c0_0 = arith.constant 0 : index
    %0 = vector.load %arg1[%c0, %c0_0] : memref<8x16xf32, #tpu.memory_space<vmem>>, vector<8x16xf32>
    %c0_1 = arith.constant 0 : index
    %c0_2 = arith.constant 0 : index
    %1 = vector.load %arg2[%c0_1, %c0_2] : memref<16x128xf32, #tpu.memory_space<vmem>>, vector<16x128xf32>
    %cst = arith.constant dense<0.000000e+00> : vector<8x128xf32>
    %2 = tpu.matmul %0, %1, %cst {dimension_numbers = #tpu.dot_dimension_numbers<[1], [0], [0], [1], [0, 0, 1, 1], [], []>} : vector<8x16xf32>, vector<16x128xf32>, vector<8x128xf32> -> vector<8x128xf32>
    %c0_3 = arith.constant 0 : index
    %c0_4 = arith.constant 0 : index
    %3 = vector.load %arg3[%c0_3, %c0_4] : memref<1x128xf32, #tpu.memory_space<vmem>>, vector<1x128xf32>
    %4 = vector.broadcast %3 : vector<1x128xf32> to vector<8x128xf32>
    %5 = arith.addf %2, %4 : vector<8x128xf32>
    %cst_5 = arith.constant 0.000000e+00 : f32
    %6 = vector.broadcast %cst_5 : f32 to vector<8x128xf32>
    %7 = arith.maximumf %5, %6 : vector<8x128xf32>
    %c0_6 = arith.constant 0 : index
    %c0_7 = arith.constant 0 : index
    %8 = vector.load %arg4[%c0_6, %c0_7] : memref<128x64xf32, #tpu.memory_space<vmem>>, vector<128x64xf32>
    %cst_8 = arith.constant dense<0.000000e+00> : vector<8x64xf32>
    %9 = tpu.matmul %7, %8, %cst_8 {dimension_numbers = #tpu.dot_dimension_numbers<[1], [0], [0], [1], [0, 0, 1, 1], [], []>} : vector<8x128xf32>, vector<128x64xf32>, vector<8x64xf32> -> vector<8x64xf32>
    %c0_9 = arith.constant 0 : index
    %c0_10 = arith.constant 0 : index
    %10 = vector.load %arg5[%c0_9, %c0_10] : memref<1x64xf32, #tpu.memory_space<vmem>>, vector<1x64xf32>
    %11 = vector.broadcast %10 : vector<1x64xf32> to vector<8x64xf32>
    %12 = arith.addf %9, %11 : vector<8x64xf32>
    %cst_11 = arith.constant 0.000000e+00 : f32
    %13 = vector.broadcast %cst_11 : f32 to vector<8x64xf32>
    %14 = arith.maximumf %12, %13 : vector<8x64xf32>
    %c0_12 = arith.constant 0 : index
    %c0_13 = arith.constant 0 : index
    %15 = vector.load %arg6[%c0_12, %c0_13] : memref<64x32xf32, #tpu.memory_space<vmem>>, vector<64x32xf32>
    %cst_14 = arith.constant dense<0.000000e+00> : vector<8x32xf32>
    %16 = tpu.matmul %14, %15, %cst_14 {dimension_numbers = #tpu.dot_dimension_numbers<[1], [0], [0], [1], [0, 0, 1, 1], [], []>} : vector<8x64xf32>, vector<64x32xf32>, vector<8x32xf32> -> vector<8x32xf32>
    %c0_15 = arith.constant 0 : index
    %c0_16 = arith.constant 0 : index
    %17 = vector.load %arg7[%c0_15, %c0_16] : memref<1x32xf32, #tpu.memory_space<vmem>>, vector<1x32xf32>
    %18 = vector.broadcast %17 : vector<1x32xf32> to vector<8x32xf32>
    %19 = arith.addf %16, %18 : vector<8x32xf32>
    %cst_17 = arith.constant 0.000000e+00 : f32
    %20 = vector.broadcast %cst_17 : f32 to vector<8x32xf32>
    %21 = arith.maximumf %19, %20 : vector<8x32xf32>
    %c0_18 = arith.constant 0 : index
    %c0_19 = arith.constant 0 : index
    %22 = vector.load %arg8[%c0_18, %c0_19] : memref<32x128xf32, #tpu.memory_space<vmem>>, vector<32x128xf32>
    %cst_20 = arith.constant dense<0.000000e+00> : vector<8x128xf32>
    %23 = tpu.matmul %21, %22, %cst_20 {dimension_numbers = #tpu.dot_dimension_numbers<[1], [0], [0], [1], [0, 0, 1, 1], [], []>} : vector<8x32xf32>, vector<32x128xf32>, vector<8x128xf32> -> vector<8x128xf32>
    %c0_21 = arith.constant 0 : index
    %c0_22 = arith.constant 0 : index
    %24 = vector.load %arg9[%c0_21, %c0_22] : memref<1x128xf32, #tpu.memory_space<vmem>>, vector<1x128xf32>
    %25 = vector.broadcast %24 : vector<1x128xf32> to vector<8x128xf32>
    %26 = arith.addf %23, %25 : vector<8x128xf32>
    %c0_23 = arith.constant 0 : index
    %c0_24 = arith.constant 0 : index
    %27 = vector.load %arg10[%c0_23, %c0_24] : memref<8x128xf32, #tpu.memory_space<vmem>>, vector<8x128xf32>
    tpu.vector_store %arg10[%c0_23, %c0_24], %26 {strides = array<i32>} : memref<8x128xf32, #tpu.memory_space<vmem>>, vector<8x128xf32>,
    return
  }
  func.func @transform_0(%arg0: i32) -> (i32, i32) {
    %c0_i32 = arith.constant 0 : i32
    %c0_i32_0 = arith.constant 0 : i32
    return %arg0, %c0_i32 : i32, i32
  }
  func.func @transform_1(%arg0: i32) -> (i32, i32) {
    %c0_i32 = arith.constant 0 : i32
    %c0_i32_0 = arith.constant 0 : i32
    %c0_i32_1 = arith.constant 0 : i32
    return %c0_i32, %c0_i32_0 : i32, i32
  }
  func.func @transform_2(%arg0: i32) -> (i32, i32) {
    %c0_i32 = arith.constant 0 : i32
    %c0_i32_0 = arith.constant 0 : i32
    %c0_i32_1 = arith.constant 0 : i32
    return %c0_i32, %c0_i32_0 : i32, i32
  }
  func.func @transform_3(%arg0: i32) -> (i32, i32) {
    %c0_i32 = arith.constant 0 : i32
    %c0_i32_0 = arith.constant 0 : i32
    %c0_i32_1 = arith.constant 0 : i32
    return %c0_i32, %c0_i32_0 : i32, i32
  }
  func.func @transform_4(%arg0: i32) -> (i32, i32) {
    %c0_i32 = arith.constant 0 : i32
    %c0_i32_0 = arith.constant 0 : i32
    %c0_i32_1 = arith.constant 0 : i32
    return %c0_i32, %c0_i32_0 : i32, i32
  }
  func.func @transform_5(%arg0: i32) -> (i32, i32) {
    %c0_i32 = arith.constant 0 : i32
    %c0_i32_0 = arith.constant 0 : i32
    %c0_i32_1 = arith.constant 0 : i32
    return %c0_i32, %c0_i32_0 : i32, i32
  }
  func.func @transform_6(%arg0: i32) -> (i32, i32) {
    %c0_i32 = arith.constant 0 : i32
    %c0_i32_0 = arith.constant 0 : i32
    %c0_i32_1 = arith.constant 0 : i32
    return %c0_i32, %c0_i32_0 : i32, i32
  }
  func.func @transform_7(%arg0: i32) -> (i32, i32) {
    %c0_i32 = arith.constant 0 : i32
    %c0_i32_0 = arith.constant 0 : i32
    %c0_i32_1 = arith.constant 0 : i32
    return %c0_i32, %c0_i32_0 : i32, i32
  }
  func.func @transform_8(%arg0: i32) -> (i32, i32) {
    %c0_i32 = arith.constant 0 : i32
    %c0_i32_0 = arith.constant 0 : i32
    %c0_i32_1 = arith.constant 0 : i32
    return %c0_i32, %c0_i32_0 : i32, i32
  }
  func.func @transform_9(%arg0: i32) -> (i32, i32) {
    %c0_i32 = arith.constant 0 : i32
    %c0_i32_0 = arith.constant 0 : i32
    return %arg0, %c0_i32 : i32, i32
  }
}

</mosaic_0001>

<bundles_post_ra>
// kernel: tpu_custom_call.1
= control target key start
LH: loop header
LB: loop body
LE: loop exit
PB: predicated region body
PF: predicated region fallthrough
CT: control target
= control target key end

     0   :  { %vm40_vm0 = vcmask 130048   ;;  %s385_s0 = inlined_call_operand.vmem [shape: f32[8,16], index: 0, kind: input, shape index: {}]   ;;  %s386_s1 = inlined_call_operand.vmem [shape: f32[16,128], index: 1, kind: input, shape index: {}]   ;;  %s387_s2 = inlined_call_operand.vmem [shape: f32[1,128], index: 2, kind: input, shape index: {}]   ;;  %s388_s3 = inlined_call_operand.vmem [shape: f32[128,64], index: 3, kind: input, shape index: {}]   ;;  %s389_s4 = inlined_call_operand.vmem [shape: f32[1,64], index: 4, kind: input, shape index: {}]   ;;  %s390_s5 = inlined_call_operand.vmem [shape: f32[64,32], index: 5, kind: input, shape index: {}]   ;;  %s391_s6 = inlined_call_operand.vmem [shape: f32[1,32], index: 6, kind: input, shape index: {}]   ;;  %s392_s7 = inlined_call_operand.vmem [shape: f32[32,128], index: 7, kind: input, shape index: {}]   ;;  %s393_s8 = inlined_call_operand.vmem [shape: f32[1,128], index: 8, kind: input, shape index: {}]   ;;  %s394_s9 = inlined_call_operand.hbm [shape: f32[8,128], index: 9, kind: output, shape index: {}]  }
   0x1   :  { %v35_v0 = vld [vmem:[%s386_s1 + $0x8] sm:$0xff]  ;;  %v34_v1 = vld [vmem:[%s386_s1] sm:$0xff]  ;;  %v80_v3 = vld [vmem:[%s388_s3 + $0x78] sm:$0xff] }
   0x2   :  { %58 = vmatpush.msra.mxu0 %v35_v0  ;;  %v33_v2 = vld [vmem:[%s385_s0] sm:$0xff]  ;;  %v79_v4 = vld [vmem:[%s388_s3 + $0x70] sm:$0xff]  ;;  %85 = vmatpush.msra.mxu1 %v80_v3  ;;  %v78_v5 = vld [vmem:[%s388_s3 + $0x68] sm:$0xff] }
   0x3   :  { %v77_v6 = vld [vmem:[%s388_s3 + $0x60] sm:$0xff]  ;;  %v76_v7 = vld [vmem:[%s388_s3 + $0x58] sm:$0xff] }
   0x4   :  { %59 = vmatpush.msra.mxu0 %v34_v1  ;;  %86 = vmatpush.msra.mxu1 %v79_v4 }
   0x5   :  { %192 = vmatmul.msk.f32.vlgmr.msra.gmra.mxu0 %vm40_vm0, %v33_v2 }
   0x6   :  { %87 = vmatpush.msra.mxu1 %v78_v5 }
   0x7   :  { %14 = vsyncpa [#allocation3], 0  ;;  %v75_v8 = vld [vmem:[%s388_s3 + $0x50] sm:$0xff]  ;;  %v74_v9 = vld [vmem:[%s388_s3 + $0x48] sm:$0xff]  ;;  %vm118_vm1 = vcmask 523264   ;;  %vm151_vm2 = vcmask 261120  }
   0x8   :  { %88 = vmatpush.msra.mxu1 %v77_v6  ;;  %v73_v10 = vld [vmem:[%s388_s3 + $0x40] sm:$0xff]  ;;  %v72_v11 = vld [vmem:[%s388_s3 + $0x38] sm:$0xff]  ;;  %v71_v12 = vld [vmem:[%s388_s3 + $0x30] sm:$0xff]  ;;  %s226_s27 = smov [#allocation2]  }
   0x9   :  { %v70_v13 = vld [vmem:[%s388_s3 + $0x28] sm:$0xff]  ;;  %v69_v14 = vld [vmem:[%s388_s3 + $0x20] sm:$0xff]  ;;  %v68_v15 = vld [vmem:[%s388_s3 + $0x18] sm:$0xff]  ;;  %s181_s28 = sshll.u32 %s226_s27, 4  ;;  %s182_s28 = int_to_ptr.vmem [resolvable:$true] %s181_s28 }
   0xa   :  { %89 = vmatpush.msra.mxu1 %v76_v7  ;;  %v67_v16 = vld [vmem:[%s388_s3 + $0x10] sm:$0xff]  ;;  %v66_v17 = vld [vmem:[%s388_s3 + $0x8] sm:$0xff]  ;;  %v65_v18 = vld [vmem:[%s388_s3] sm:$0xff] }
   0xb   :  { %v113_v19 = vld [vmem:[%s390_s5 + $0x38] sm:$0xff]  ;;  %v112_v20 = vld [vmem:[%s390_s5 + $0x30] sm:$0xff]  ;;  %v111_v21 = vld [vmem:[%s390_s5 + $0x28] sm:$0xff] }
   0xc   :  { %90 = vmatpush.msra.mxu1 %v75_v8  ;;  %130 = vmatpush.msra.mxu2 %v113_v19  ;;  %v110_v22 = vld [vmem:[%s390_s5 + $0x20] sm:$0xff]  ;;  %v109_v23 = vld [vmem:[%s390_s5 + $0x18] sm:$0xff]  ;;  %v108_v28 = vld [vmem:[%s390_s5 + $0x10] sm:$0xff] }
   0xd   :  { %v196_v24 = vld [vmem:[%s387_s2] ss:$0 sm:$0xff]  ;;  %v107_v29 = vld [vmem:[%s390_s5 + $0x8] sm:$0xff]  ;;  %v146_v31 = vld [vmem:[%s392_s7 + $0x18] sm:$0xff] }
   0xe   :  { %91 = vmatpush.msra.mxu1 %v74_v9  ;;  %131 = vmatpush.msra.mxu2 %v112_v20  ;;  %v106_v30 = vld [vmem:[%s390_s5] sm:$0xff]  ;;  %v145_v36 = vld [vmem:[%s392_s7 + $0x10] sm:$0xff]  ;;  %v144_v37 = vld [vmem:[%s392_s7 + $0x8] sm:$0xff] }
   0xf   :  { %167 = vmatpush.msra.mxu3 %v146_v31  ;;  %v197_v32 = vld [vmem:[%s389_s4] ss:$0 sm:$0xff] }
  0x10   :  { %92 = vmatpush.msra.mxu1 %v73_v10  ;;  %132 = vmatpush.msra.mxu2 %v111_v21  ;;  %v143_v38 = vld [vmem:[%s392_s7] sm:$0xff]  ;;  %s183_s7 = sshll.u32 %s394_s9, 4  ;;  %s184_s7 = int_to_ptr.hbm [resolvable:$true] %s183_s7 }
  0x11   :  { %168 = vmatpush.msra.mxu3 %v145_v36  ;;  %v198_v39 = vld [vmem:[%s391_s6] ss:$0 sm:$0xff] }
  0x12   :  { %93 = vmatpush.msra.mxu1 %v72_v11  ;;  %133 = vmatpush.msra.mxu2 %v110_v22  ;;  %v199_v43 = vld [vmem:[%s393_s8] ss:$0 sm:$0xff] }
  0x13   :  { %169 = vmatpush.msra.mxu3 %v144_v37 }
  0x14   :  { %94 = vmatpush.msra.mxu1 %v71_v12  ;;  %134 = vmatpush.msra.mxu2 %v109_v23 }
  0x15   :  { %170 = vmatpush.msra.mxu3 %v143_v38 }
  0x16   :  { %95 = vmatpush.msra.mxu1 %v70_v13  ;;  %135 = vmatpush.msra.mxu2 %v108_v28 }
  0x18   :  { %96 = vmatpush.msra.mxu1 %v69_v14  ;;  %136 = vmatpush.msra.mxu2 %v107_v29 }
  0x1a   :  { %97 = vmatpush.msra.mxu1 %v68_v15  ;;  %137 = vmatpush.msra.mxu2 %v106_v30 }
  0x1c   :  { %98 = vmatpush.msra.mxu1 %v67_v16 }
  0x1e   :  { %99 = vmatpush.msra.mxu1 %v66_v17 }
  0x20   :  { %100 = vmatpush.msra.mxu1 %v65_v18 }
  0x82   :  { %v61_v25 = vpop.f32.mrf.mxu0 }
  0x83   :  { %v62_v26 = vadd.f32 %v196_v24, %v61_v25 }
  0x85   :  { %v64_v27 = vmax.f32 %v62_v26, 0.0 }
  0x87   :  { %101 = vmatmul.f32.vlgmr.msra.gmra.mxu1 %v64_v27 }
 0x104   :  { %v102_v33 = vpop.f32.mrf.mxu1 }
 0x105   :  { %v103_v34 = vadd.f32 %v197_v32, %v102_v33 }
 0x107   :  { %v105_v35 = vmax.f32 %v103_v34, 0.0 }
 0x109   :  { %193 = vmatmul.msk.f32.vlgmr.msra.gmra.mxu2 %vm118_vm1, %v105_v35 }
 0x18c   :  { %v139_v40 = vpop.f32.mrf.mxu2 }
 0x18d   :  { %v140_v41 = vadd.f32 %v198_v39, %v139_v40 }
 0x18f   :  { %v142_v42 = vmax.f32 %v140_v41, 0.0 }
 0x191   :  { %194 = vmatmul.msk.f32.vlgmr.msra.gmra.mxu3 %vm151_vm2, %v142_v42 }
 0x214   :  { %v172_v44 = vpop.f32.mrf.mxu3 }
 0x215   :  { %v173_v45 = vadd.f32 %v199_v43, %v172_v44 }
 0x217   :  { %175 = vst [vmem:[#allocation2] sm:$0xff] %v173_v45 }
 0x218   :  { %186 = dma.vmem_to_hbm [thread:$0]  %s182_s28, 128, %s184_s7, [#allocation3]  }
 0x219   :  { %224 = dma.done.wait [#allocation3], 128  }
 0x21a   :  { %225 = vsyncadd [#allocation3], 4294967168 }
 0x21b   :  { %191 = vsyncpa [#allocation3], 1 }

</bundles_post_ra>
